<compile_context>
chip_gen: v6e
topology: v6e:2x2x1
jax: 0.10.0
libtpu: 0.0.40
codegen_flags: <defaults>
</compile_context>

<pallas_src>
import jax
import jax.numpy as jnp
from jax.experimental import pallas as pl
from jax.experimental.pallas import tpu as pltpu

_LANE = 128


# ---------------------------------------------------------------------------
# helpers
# ---------------------------------------------------------------------------

def _get_activation(name):
    if name == "tanh":
        return jnp.tanh
    if name == "relu":
        return lambda x: jnp.maximum(x, 0.0)
    raise ValueError("Invalid activation type. Choose 'relu' or 'tanh'.")


def _round_up(x, m):
    return ((x + m - 1) // m) * m


def _batch_tile(batch):
    # Whole batch in a single block up to 1024 rows (weights resident, no
    # per-grid-step overhead).  Beyond that, split into >=2 tiles so the
    # "parallel" batch axis can shard across the two v7x TensorCores; tiles
    # capped at 2048 rows and kept a multiple of the 8-row sublane granule.
    if batch <= 1024:
        return batch
    return min(2048, _round_up(pl.cdiv(batch, 2), 8))


def _compiler_params():
    # Scoped-VMEM budget: ~3/4 of physical VMEM (v5e/v6e: 128 MiB, v7x: 64 MiB),
    # with a safe fallback if the query is unavailable.
    try:
        phys = pltpu.get_tpu_info().vmem_capacity_bytes
        limit = int(min(96 * 1024 * 1024, (phys * 3) // 4))
    except Exception:
        limit = 48 * 1024 * 1024
    return pltpu.CompilerParams(
        dimension_semantics=("parallel",),   # batch tiles are independent
        vmem_limit_bytes=limit,
    )


def _pad_cols(x, total):
    pad = total - x.shape[-1]
    if pad == 0:
        return x
    return jnp.pad(x, [(0, 0)] * (x.ndim - 1) + [(0, pad)])


# ---------------------------------------------------------------------------
# 'linear' combiner (factory default)
# ---------------------------------------------------------------------------

def _make_linear_kernel(activation):
    act = _get_activation(activation)

    def kernel(z_ref, rnn_ref, alpha_ref, win_ref, bin_ref, wout_ref, bout_ref,
               out_ref):
        # One MXU pass covers every rnn branch (weights stacked on the N axis).
        h = jnp.dot(z_ref[...].astype(jnp.bfloat16), win_ref[...],
                    preferred_element_type=jnp.float32)
        z_mapped = act(h + bin_ref[...])
        a = alpha_ref[...]                         # (1, R) f32, broadcast rows
        combined = a * z_mapped + (1.0 - a) * rnn_ref[...]
        out = jnp.dot(combined.astype(jnp.bfloat16), wout_ref[...],
                      preferred_element_type=jnp.float32) + bout_ref[...]
        out_ref[...] = out.astype(out_ref.dtype)

    return kernel


def dkf_combiner_linear(z_prev, rnn_hs, alphas, w_in, b_in, w_out, b_out,
                        activation="tanh"):
    """Pallas equivalent of DKF_CombinerLinear.forward.

    z_prev: (B, z_dim);  rnn_hs: list of (B, rnn_dim_i)
    alphas: per-branch alpha values (pass alpha_init on the first call,
            alpha_run afterwards).
    w_in:   list of (z_dim, rnn_dim_i);  b_in: list of (rnn_dim_i,)
    w_out:  (sum(rnn_dims), output_dim); b_out: (output_dim,)
    """
    # TODO(synk): the alpha_init -> alpha_run switch in the PyTorch module is
    # host-side Python state; the caller passes the appropriate alphas per call.
    # TODO(synk): when invoked once per DKF time step with tiny batches, weight
    # traffic could be amortised with a cross-call weight-resident scheme.
    B, Z = z_prev.shape
    rnn_dims = [int(h.shape[1]) for h in rnn_hs]
    R = sum(rnn_dims)
    O = int(w_out.shape[1])
    assert int(w_out.shape[0]) == R

    # Wrapper-side prep (cheap XLA ops, once per call):
    #  * stack per-branch weights/biases/hidden-states along the feature axis,
    #  * expand the per-branch alphas to a (1, R) vector,
    #  * cast matmul weights to bf16 (MXU-native), keep f32 element-wise math,
    #  * pad the output dim to a multiple of 128 lanes (lane-dense stores).
    O_pad = _round_up(max(O, _LANE), _LANE)

    w_in_cat = jnp.concatenate(list(w_in), axis=1).astype(jnp.bfloat16)
    b_in_cat = jnp.concatenate(
        [jnp.asarray(b, jnp.float32).reshape(-1) for b in b_in]).reshape(1, R)
    rnn_cat = jnp.concatenate(list(rnn_hs), axis=1)
    alpha_vec = jnp.concatenate(
        [jnp.broadcast_to(jnp.asarray(a, jnp.float32).reshape(()), (r,))
         for a, r in zip(alphas, rnn_dims)]).reshape(1, R)
    w_out_p = _pad_cols(w_out, O_pad).astype(jnp.bfloat16)
    b_out_p = _pad_cols(jnp.asarray(b_out, jnp.float32).reshape(1, O), O_pad)

    TB = _batch_tile(B)
    grid = (pl.cdiv(B, TB),)

    def batch_spec(d):
        return pl.BlockSpec((TB, d), lambda i: (i, 0))

    def full_spec(shape):
        return pl.BlockSpec(shape, lambda i: (0, 0))

    out_pad = pl.pallas_call(
        _make_linear_kernel(activation),
        out_shape=jax.ShapeDtypeStruct((B, O_pad), z_prev.dtype),
        grid=grid,
        in_specs=[batch_spec(Z), batch_spec(R), full_spec((1, R)),
                  full_spec((Z, R)), full_spec((1, R)),
                  full_spec((R, O_pad)), full_spec((1, O_pad))],
        out_specs=batch_spec(O_pad),
        compiler_params=_compiler_params(),
    )(z_prev, rnn_cat, alpha_vec, w_in_cat, b_in_cat, w_out_p, b_out_p)

    return out_pad[:, :O] if O_pad != O else out_pad


# ---------------------------------------------------------------------------
# 'mlp' combiner
# ---------------------------------------------------------------------------

def _make_mlp_kernel(n_hidden, activation):
    act = _get_activation(activation)

    def kernel(*refs):
        # refs: x, (W_j, b_j) * n_hidden, W_out, b_out, out
        x_ref = refs[0]
        out_ref = refs[-1]
        h = x_ref[...]
        pos = 1
        for _ in range(n_hidden):
            w_ref, b_ref = refs[pos], refs[pos + 1]
            pos += 2
            h = act(jnp.dot(h.astype(jnp.bfloat16), w_ref[...],
                            preferred_element_type=jnp.float32) + b_ref[...])
        w_ref, b_ref = refs[pos], refs[pos + 1]
        out_ref[...] = (jnp.dot(h.astype(jnp.bfloat16), w_ref[...],
                                preferred_element_type=jnp.float32)
                        + b_ref[...]).astype(out_ref.dtype)

    return kernel


def dkf_combiner_mlp(z_prev, rnn_hs, w_first, b_first, hidden_ws, hidden_bs,
                     w_out, b_out, activation="tanh"):
    """Pallas equivalent of DKF_CombinerMLP.forward.

    w_first:   (z_dim + sum(rnn_dims), layers_dim[0])
    hidden_ws: list of (layers_dim[j-1], layers_dim[j]) for j = 1..len-1
    w_out:     (layers_dim[-1], output_dim)
    """
    B, Z = z_prev.shape
    rnn_dims = [int(h.shape[1]) for h in rnn_hs]
    D_in = Z + sum(rnn_dims)
    assert int(w_first.shape[0]) == D_in
    O = int(w_out.shape[1])
    O_pad = _round_up(max(O, _LANE), _LANE)

    # One cheap HBM concat in the wrapper so the kernel does a single K=D_in
    # first-layer matmul instead of per-input K=32/64 dots.
    x_cat = jnp.concatenate([z_prev] + list(rnn_hs), axis=1)

    hidden_w_list = [w_first] + list(hidden_ws)
    hidden_b_list = [b_first] + list(hidden_bs)
    n_hidden = len(hidden_w_list)

    TB = _batch_tile(B)
    grid = (pl.cdiv(B, TB),)

    def batch_spec(d):
        return pl.BlockSpec((TB, d), lambda i: (i, 0))

    def full_spec(shape):
        return pl.BlockSpec(shape, lambda i: (0, 0))

    in_specs = [batch_spec(D_in)]
    args = [x_cat]
    for w, b in zip(hidden_w_list, hidden_b_list):
        w_bf = jnp.asarray(w).astype(jnp.bfloat16)
        b2 = jnp.asarray(b, jnp.float32).reshape(1, -1)
        in_specs += [full_spec(w_bf.shape), full_spec(b2.shape)]
        args += [w_bf, b2]
    w_out_p = _pad_cols(jnp.asarray(w_out), O_pad).astype(jnp.bfloat16)
    b_out_p = _pad_cols(jnp.asarray(b_out, jnp.float32).reshape(1, O), O_pad)
    in_specs += [full_spec(w_out_p.shape), full_spec(b_out_p.shape)]
    args += [w_out_p, b_out_p]

    out_pad = pl.pallas_call(
        _make_mlp_kernel(n_hidden, activation),
        out_shape=jax.ShapeDtypeStruct((B, O_pad), z_prev.dtype),
        grid=grid,
        in_specs=in_specs,
        out_specs=batch_spec(O_pad),
        compiler_params=_compiler_params(),
    )(*args)

    return out_pad[:, :O] if O_pad != O else out_pad


# ---------------------------------------------------------------------------
# factory dispatch (mirrors DKF_CombinerFactory.forward)
# ---------------------------------------------------------------------------

def dkf_combiner_forward(combiner_type, z_prev, rnn_hs, **params):
    if combiner_type == "linear":
        return dkf_combiner_linear(z_prev, rnn_hs, **params)
    if combiner_type == "mlp":
        return dkf_combiner_mlp(z_prev, rnn_hs, **params)
    raise ValueError("combiner_type must be either 'linear' or 'mlp'")


# ---------------------------------------------------------------------------
# example / self-test
# ---------------------------------------------------------------------------

if __name__ == "__main__":
    key = jax.random.PRNGKey(0)
    ks = jax.random.split(key, 16)

    batch, z_dim, output_dim = 4, 32, 32
    rnn_dims = [32, 64]

    z_prev = jax.random.normal(ks[0], (batch, z_dim), jnp.float32)
    rnn_hs = [jax.random.normal(ks[1 + i], (batch, r), jnp.float32)
              for i, r in enumerate(rnn_dims)]

    # ---------------- linear combiner (factory default) ----------------
    w_in = [jax.random.normal(ks[3 + i], (z_dim, r), jnp.float32) * (z_dim ** -0.5)
            for i, r in enumerate(rnn_dims)]
    b_in = [0.01 * jax.random.normal(ks[5 + i], (r,), jnp.float32)
            for i, r in enumerate(rnn_dims)]
    w_out_l = jax.random.normal(ks[7], (sum(rnn_dims), output_dim),
                                jnp.float32) * (sum(rnn_dims) ** -0.5)
    b_out_l = 0.01 * jax.random.normal(ks[8], (output_dim,), jnp.float32)
    alpha_init = [0.3, 0.7]     # first forward pass uses alpha_init

    out_lin = jax.block_until_ready(
        dkf_combiner_forward("linear", z_prev, rnn_hs, alphas=alpha_init,
                             w_in=w_in, b_in=b_in, w_out=w_out_l, b_out=b_out_l,
                             activation="tanh"))

    comb = []
    for i in range(len(rnn_dims)):
        zm = jnp.tanh(z_prev @ w_in[i] + b_in[i])
        comb.append(alpha_init[i] * zm + (1.0 - alpha_init[i]) * rnn_hs[i])
    ref_lin = jnp.concatenate(comb, axis=1) @ w_out_l + b_out_l

    assert out_lin.shape == (batch, output_dim)
    assert out_lin.dtype == jnp.float32
    # bf16 matmul operands with f32 accumulation -> relaxed tolerance vs f32 ref
    assert bool(jnp.allclose(out_lin, ref_lin, atol=5e-2, rtol=5e-2))

    # ---------------- mlp combiner ----------------
    layers_dim = [64, 32]
    in_dim = z_dim + sum(rnn_dims)
    w0 = jax.random.normal(ks[9], (in_dim, layers_dim[0]),
                           jnp.float32) * (in_dim ** -0.5)
    b0 = 0.01 * jax.random.normal(ks[10], (layers_dim[0],), jnp.float32)
    w1 = jax.random.normal(ks[11], (layers_dim[0], layers_dim[1]),
                           jnp.float32) * (layers_dim[0] ** -0.5)
    b1 = 0.01 * jax.random.normal(ks[12], (layers_dim[1],), jnp.float32)
    w_out_m = jax.random.normal(ks[13], (layers_dim[1], output_dim),
                                jnp.float32) * (layers_dim[1] ** -0.5)
    b_out_m = 0.01 * jax.random.normal(ks[14], (output_dim,), jnp.float32)

    out_mlp = jax.block_until_ready(
        dkf_combiner_forward("mlp", z_prev, rnn_hs, w_first=w0, b_first=b0,
                             hidden_ws=[w1], hidden_bs=[b1],
                             w_out=w_out_m, b_out=b_out_m, activation="tanh"))

    x_cat = jnp.concatenate([z_prev] + rnn_hs, axis=1)
    h = jnp.tanh(x_cat @ w0 + b0)
    h = jnp.tanh(h @ w1 + b1)
    ref_mlp = h @ w_out_m + b_out_m

    assert out_mlp.shape == (batch, output_dim)
    assert bool(jnp.allclose(out_mlp, ref_mlp, atol=5e-2, rtol=5e-2))

    print("KERNEL_OK")
</pallas_src>

<mosaic_0001>
module attributes {stable_mosaic.version = 11 : i64} {
  func.func @kernel(%arg0: i32, %arg1: memref<4x32xf32, #tpu.memory_space<vmem>>, %arg2: memref<4x96xf32, #tpu.memory_space<vmem>>, %arg3: memref<1x96xf32, #tpu.memory_space<vmem>>, %arg4: memref<32x96xbf16, #tpu.memory_space<vmem>>, %arg5: memref<1x96xf32, #tpu.memory_space<vmem>>, %arg6: memref<96x128xbf16, #tpu.memory_space<vmem>>, %arg7: memref<1x128xf32, #tpu.memory_space<vmem>>, %arg8: memref<4x128xf32, #tpu.memory_space<vmem>>) attributes {dimension_semantics = [#tpu.dimension_semantics<parallel>], iteration_bounds = array<i64: 1>, scalar_prefetch = 0 : i64, scratch_operands = 0 : i64, tpu.core_type = #tpu.core_type<tc>, window_params = [{transform_indices = @transform_0, window_bounds = array<i64: 4, 32>}, {transform_indices = @transform_1, window_bounds = array<i64: 4, 96>}, {pipeline_mode = #tpu.pipeline_mode<synchronous>, transform_indices = @transform_2, window_bounds = array<i64: 1, 96>}, {pipeline_mode = #tpu.pipeline_mode<synchronous>, transform_indices = @transform_3, window_bounds = array<i64: 32, 96>}, {pipeline_mode = #tpu.pipeline_mode<synchronous>, transform_indices = @transform_4, window_bounds = array<i64: 1, 96>}, {pipeline_mode = #tpu.pipeline_mode<synchronous>, transform_indices = @transform_5, window_bounds = array<i64: 96, 128>}, {pipeline_mode = #tpu.pipeline_mode<synchronous>, transform_indices = @transform_6, window_bounds = array<i64: 1, 128>}, {transform_indices = @transform_7, window_bounds = array<i64: 4, 128>}]} {
    %c0 = arith.constant 0 : index
    %c0_0 = arith.constant 0 : index
    %0 = vector.load %arg1[%c0, %c0_0] : memref<4x32xf32, #tpu.memory_space<vmem>>, vector<4x32xf32>
    %1 = arith.truncf %0 : vector<4x32xf32> to vector<4x32xbf16>
    %c0_1 = arith.constant 0 : index
    %c0_2 = arith.constant 0 : index
    %2 = vector.load %arg4[%c0_1, %c0_2] : memref<32x96xbf16, #tpu.memory_space<vmem>>, vector<32x96xbf16>
    %cst = arith.constant dense<0.000000e+00> : vector<4x96xf32>
    %3 = tpu.matmul %1, %2, %cst {dimension_numbers = #tpu.dot_dimension_numbers<[1], [0], [0], [1], [0, 0, 1, 1], [], []>} : vector<4x32xbf16>, vector<32x96xbf16>, vector<4x96xf32> -> vector<4x96xf32>
    %c0_3 = arith.constant 0 : index
    %c0_4 = arith.constant 0 : index
    %4 = vector.load %arg5[%c0_3, %c0_4] : memref<1x96xf32, #tpu.memory_space<vmem>>, vector<1x96xf32>
    %5 = vector.broadcast %4 : vector<1x96xf32> to vector<4x96xf32>
    %6 = arith.addf %3, %5 : vector<4x96xf32>
    %7 = math.tanh %6 : vector<4x96xf32>
    %c0_5 = arith.constant 0 : index
    %c0_6 = arith.constant 0 : index
    %8 = vector.load %arg3[%c0_5, %c0_6] : memref<1x96xf32, #tpu.memory_space<vmem>>, vector<1x96xf32>
    %9 = vector.broadcast %8 : vector<1x96xf32> to vector<4x96xf32>
    %10 = arith.mulf %9, %7 : vector<4x96xf32>
    %cst_7 = arith.constant 1.000000e+00 : f32
    %11 = vector.broadcast %cst_7 : f32 to vector<1x96xf32>
    %12 = arith.subf %11, %8 : vector<1x96xf32>
    %c0_8 = arith.constant 0 : index
    %c0_9 = arith.constant 0 : index
    %13 = vector.load %arg2[%c0_8, %c0_9] : memref<4x96xf32, #tpu.memory_space<vmem>>, vector<4x96xf32>
    %14 = vector.broadcast %12 : vector<1x96xf32> to vector<4x96xf32>
    %15 = arith.mulf %14, %13 : vector<4x96xf32>
    %16 = arith.addf %10, %15 : vector<4x96xf32>
    %17 = arith.truncf %16 : vector<4x96xf32> to vector<4x96xbf16>
    %c0_10 = arith.constant 0 : index
    %c0_11 = arith.constant 0 : index
    %18 = vector.load %arg6[%c0_10, %c0_11] : memref<96x128xbf16, #tpu.memory_space<vmem>>, vector<96x128xbf16>
    %cst_12 = arith.constant dense<0.000000e+00> : vector<4x128xf32>
    %19 = tpu.matmul %17, %18, %cst_12 {dimension_numbers = #tpu.dot_dimension_numbers<[1], [0], [0], [1], [0, 0, 1, 1], [], []>} : vector<4x96xbf16>, vector<96x128xbf16>, vector<4x128xf32> -> vector<4x128xf32>
    %c0_13 = arith.constant 0 : index
    %c0_14 = arith.constant 0 : index
    %20 = vector.load %arg7[%c0_13, %c0_14] : memref<1x128xf32, #tpu.memory_space<vmem>>, vector<1x128xf32>
    %21 = vector.broadcast %20 : vector<1x128xf32> to vector<4x128xf32>
    %22 = arith.addf %19, %21 : vector<4x128xf32>
    %c0_15 = arith.constant 0 : index
    %c0_16 = arith.constant 0 : index
    %23 = vector.load %arg8[%c0_15, %c0_16] : memref<4x128xf32, #tpu.memory_space<vmem>>, vector<4x128xf32>
    tpu.vector_store %arg8[%c0_15, %c0_16], %22 {strides = array<i32>} : memref<4x128xf32, #tpu.memory_space<vmem>>, vector<4x128xf32>,
    return
  }
  func.func @transform_0(%arg0: i32) -> (i32, i32) {
    %c0_i32 = arith.constant 0 : i32
    %c0_i32_0 = arith.constant 0 : i32
    return %arg0, %c0_i32 : i32, i32
  }
  func.func @transform_1(%arg0: i32) -> (i32, i32) {
    %c0_i32 = arith.constant 0 : i32
    %c0_i32_0 = arith.constant 0 : i32
    return %arg0, %c0_i32 : i32, i32
  }
  func.func @transform_2(%arg0: i32) -> (i32, i32) {
    %c0_i32 = arith.constant 0 : i32
    %c0_i32_0 = arith.constant 0 : i32
    %c0_i32_1 = arith.constant 0 : i32
    return %c0_i32, %c0_i32_0 : i32, i32
  }
  func.func @transform_3(%arg0: i32) -> (i32, i32) {
    %c0_i32 = arith.constant 0 : i32
    %c0_i32_0 = arith.constant 0 : i32
    %c0_i32_1 = arith.constant 0 : i32
    return %c0_i32, %c0_i32_0 : i32, i32
  }
  func.func @transform_4(%arg0: i32) -> (i32, i32) {
    %c0_i32 = arith.constant 0 : i32
    %c0_i32_0 = arith.constant 0 : i32
    %c0_i32_1 = arith.constant 0 : i32
    return %c0_i32, %c0_i32_0 : i32, i32
  }
  func.func @transform_5(%arg0: i32) -> (i32, i32) {
    %c0_i32 = arith.constant 0 : i32
    %c0_i32_0 = arith.constant 0 : i32
    %c0_i32_1 = arith.constant 0 : i32
    return %c0_i32, %c0_i32_0 : i32, i32
  }
  func.func @transform_6(%arg0: i32) -> (i32, i32) {
    %c0_i32 = arith.constant 0 : i32
    %c0_i32_0 = arith.constant 0 : i32
    %c0_i32_1 = arith.constant 0 : i32
    return %c0_i32, %c0_i32_0 : i32, i32
  }
  func.func @transform_7(%arg0: i32) -> (i32, i32) {
    %c0_i32 = arith.constant 0 : i32
    %c0_i32_0 = arith.constant 0 : i32
    return %arg0, %c0_i32 : i32, i32
  }
}

</mosaic_0001>

<bundles_post_ra>
// kernel: tpu_custom_call.1
= control target key start
LH: loop header
LB: loop body
LE: loop exit
PB: predicated region body
PF: predicated region fallthrough
CT: control target
= control target key end

     0   :  { %12 = vsyncpa [#allocation3], 0  ;;  %s531_s0 = inlined_call_operand.hbm [shape: f32[4,32], index: 0, kind: input, shape index: {}]   ;;  %s532_s1 = inlined_call_operand.hbm [shape: f32[4,96], index: 1, kind: input, shape index: {}]   ;;  %s533_s2 = inlined_call_operand.vmem [shape: f32[1,96], index: 2, kind: input, shape index: {}]   ;;  %s534_s3 = inlined_call_operand.hbm [shape: bf16[32,96], index: 3, kind: input, shape index: {}]   ;;  %s535_s4 = inlined_call_operand.vmem [shape: f32[1,96], index: 4, kind: input, shape index: {}]   ;;  %s536_s5 = inlined_call_operand.hbm [shape: bf16[96,128], index: 5, kind: input, shape index: {}]   ;;  %s537_s6 = inlined_call_operand.vmem [shape: f32[1,128], index: 6, kind: input, shape index: {}]   ;;  %s538_s7 = inlined_call_operand.hbm [shape: f32[4,128], index: 7, kind: output, shape index: {}]  }
   0x1   :  { %13 = vsyncpa [#allocation6], 0 }
   0x2   :  { %14 = vsyncpa [#allocation9], 0 }
   0x3   :  { %15 = vsyncpa [#allocation4], 0  ;;  %s458_s24 = smov [#allocation5]   ;;  %s459_s26 = smov [#allocation2]  }
   0x4   :  { %s32_s25 = sshll.u32 %s458_s24, 4  ;;  %s22_s27 = sshll.u32 %s459_s26, 4  ;;  %s33_s25 = int_to_ptr.vmem [resolvable:$true] %s32_s25  ;;  %s23_s27 = int_to_ptr.vmem [resolvable:$true] %s22_s27 }
   0x5   :  { %s358_s28 = scalar_lea.vmem %s33_s25, 64  ;;  %p363_p1 = scmp.lt.s32.totalorder %s33_s25, %s33_s25 }
   0x6   :  { %p359_p0 = scmp.ne.s32.totalorder %s33_s25, %s358_s28  ;;  %p364_p2 = scmp.lt.s32.totalorder %s358_s28, %s358_s28 }
   0x8   :  { %p365_p3 = por %p364_p2, %p363_p1 }
   0xa   :  { %p366_p4 = pnand %p365_p3, %p359_p0 }
   0xc   :  { %369 = shalt.err (!%p366_p4)
}
   0xd   :  { %35 = dma.hbm_to_vmem [thread:$0]  %s532_s1, 64, %s33_s25, [#allocation6]  }
   0xe   :  { %s378_s8 = scalar_lea.vmem %s23_s27, 64  ;;  %p383_p6 = scmp.lt.s32.totalorder %s23_s27, %s23_s27 }
   0xf   :  { %p379_p5 = scmp.ne.s32.totalorder %s23_s27, %s378_s8  ;;  %p384_p7 = scmp.lt.s32.totalorder %s378_s8, %s378_s8 }
  0x11   :  { %p385_p8 = por %p384_p7, %p383_p6 }
  0x13   :  { %p386_p9 = pnand %p385_p8, %p379_p5 }
  0x15   :  { %389 = shalt.err (!%p386_p9)
}
  0x16   :  { %25 = dma.hbm_to_vmem [thread:$0]  %s531_s0, 64, %s23_s27, [#allocation3]  }
  0x17   :  { %s460_s11 = smov [#allocation7]  }
  0x18   :  { %s43_s12 = sshll.u32 %s460_s11, 4  ;;  %s44_s12 = int_to_ptr.vmem [resolvable:$true] %s43_s12 }
  0x19   :  { %s398_s13 = scalar_lea.vmem %s44_s12, 256  ;;  %p403_p11 = scmp.lt.s32.totalorder %s44_s12, %s44_s12 }
  0x1a   :  { %p399_p10 = scmp.ne.s32.totalorder %s44_s12, %s398_s13  ;;  %p404_p12 = scmp.lt.s32.totalorder %s398_s13, %s398_s13 }
  0x1c   :  { %p405_p13 = por %p404_p12, %p403_p11 }
  0x1e   :  { %p406_p0 = pnand %p405_p13, %p399_p10 }
  0x20   :  { %409 = shalt.err (!%p406_p0)
}
  0x21   :  { %s461_s1 = smov 64   ;;  %s462_s14 = smov 4  }
  0x22   :  { %49 = dma.hbm_to_vmem [thread:$0]  %s534_s3, 256, %s44_s12, [#allocation6], %s461_s1, %s461_s1, %s462_s14  }
  0x23   :  { %s463_s17 = smov [#allocation8]  }
  0x24   :  { %s57_s18 = sshll.u32 %s463_s17, 4  ;;  %s58_s18 = int_to_ptr.vmem [resolvable:$true] %s57_s18 }
  0x25   :  { %s418_s0 = scalar_lea.vmem %s58_s18, 768  ;;  %p423_p2 = scmp.lt.s32.totalorder %s58_s18, %s58_s18 }
  0x26   :  { %p419_p1 = scmp.ne.s32.totalorder %s58_s18, %s418_s0  ;;  %p424_p3 = scmp.lt.s32.totalorder %s418_s0, %s418_s0 }
  0x28   :  { %p425_p4 = por %p424_p3, %p423_p2 }
  0x2a   :  { %p426_p5 = pnand %p425_p4, %p419_p1 }
  0x2c   :  { %429 = shalt.err (!%p426_p5)
}
  0x2d   :  { %63 = dma.hbm_to_vmem [thread:$0]  %s536_s5, 768, %s58_s18, [#allocation9], %s461_s1, %s461_s1, %s462_s14  }
  0x2e   :  { %450 = dma.done.wait [#allocation3], 64  }
  0x2f   :  { %451 = vsyncadd [#allocation3], 4294967232 }
  0x30   :  { %452 = dma.done.wait [#allocation6], 320  }
  0x31   :  { %453 = vsyncadd [#allocation6], 4294966976 }
  0x32   :  { %454 = dma.done.wait [#allocation9], 768  }
  0x33   :  { %455 = vsyncadd [#allocation9], 4294966528  ;;  %v464_v0 = vmov 0.0   ;;  %vm465_vm0 = vmmov 0   ;;  %v340_v1 = vld [vmem:[#allocation7 + $0x8] sm:$0xff]   ;;  %v341_v2 = vld [vmem:[#allocation7] sm:$0xff]   ;;  %v151_v12 = vlaneseq }
  0x34   :  { %307 = vmatprep.subr.bf16.mxu0 %v464_v0  ;;  %311 = vmatprep.mubr.msk.bf16.mxu0 %vm465_vm0, %v464_v0  ;;  %v79_v3 = vld [vmem:[#allocation2] sm:$0xf]  ;;  %vm104_vm1 = vcmask 261120   ;;  %v343_v6 = vld [vmem:[#allocation8 + $0x20] sm:$0xff]   ;;  %v344_v7 = vld [vmem:[#allocation8 + $0x18] sm:$0xff]   ;;  %vm223_vm2 = vcmask 785408  }
  0x35   :  { %315 = vmatprep.subr.bf16.mxu1 %v464_v0  ;;  %327 = vmatprep.mubr.msk.bf16.mxu1 %vm465_vm0, %v464_v0  ;;  %v80_v4 = vpack.c.bf16 %v79_v3, %v79_v3  ;;  %v342_v5 = vld [vmem:[#allocation8 + $0x28] sm:$0xff]   ;;  %v345_v8 = vld [vmem:[#allocation8 + $0x10] sm:$0xff]   ;;  %v347_v10 = vld [vmem:[#allocation8] sm:$0xff]   ;;  %v152_v16 = vshrl.u32 %v151_v12, 7  ;;  %s466_s24 = smov [#allocation10]  }
  0x36   :  { %308 = vmatpush3.bf16.msra.mxu0 %v340_v1  ;;  %316 = vmatpush3.bf16.msra.mxu1 %v342_v5  ;;  %v346_v9 = vld [vmem:[#allocation8 + $0x8] sm:$0xff]   ;;  %s274_s25 = sshll.u32 %s466_s24, 4  ;;  %s275_s25 = int_to_ptr.vmem [resolvable:$true] %s274_s25 }
  0x37   :  { %309 = vmatprep.subr.bf16.mxu0 %v464_v0  ;;  %317 = vmatprep.subr.bf16.mxu1 %v464_v0  ;;  %v285_v11 = vld [vmem:[%s535_s4] ss:$0 sm:$0xff]  ;;  %v153_v20 = vsub.s32 0, %v152_v16  ;;  %v158_v23 = vld [vmem:[#allocation5] sm:$0xf]  ;;  %p435_p7 = scmp.lt.s32.totalorder %s275_s25, %s275_s25 }
  0x38   :  { %v149_v18 = vld [vmem:[%s533_s2] sm:$0x1]  ;;  %s430_s2 = scalar_lea.vmem %s275_s25, 64 }
  0x39   :  { %v157_v21 = vsub.f32 1.0, %v149_v18  ;;  %v154_v24 = vrot.slane %v149_v18, %v153_v20  ;;  %v289_v30 = vld [vmem:[%s537_s6] ss:$0 sm:$0xff]  ;;  %p431_p6 = scmp.ne.s32.totalorder %s275_s25, %s430_s2  ;;  %p436_p8 = scmp.lt.s32.totalorder %s430_s2, %s430_s2 }
  0x3a   :  { %310 = vmatpush3.bf16.msra.mxu0 %v341_v2  ;;  %318 = vmatpush3.bf16.msra.mxu1 %v343_v6 }
  0x3b   :  { %319 = vmatprep.subr.bf16.mxu1 %v464_v0  ;;  %v163_v22 = vrot.slane %v157_v21, %v153_v20  ;;  %p437_p9 = por %p436_p8, %p435_p7 }
  0x3d   :  { %312 = vmatmul.mubr.msk.bf16.vlgmr.msra.gmra.mxu0 %vm104_vm1, %v80_v4  ;;  %v165_v25 = vmul.f32 %v163_v22, %v158_v23  ;;  %p438_p10 = pnand %p437_p9, %p431_p6 }
  0x3e   :  { %320 = vmatpush3.bf16.msra.mxu1 %v344_v7 }
  0x3f   :  { %321 = vmatprep.subr.bf16.mxu1 %v464_v0 }
  0x42   :  { %322 = vmatpush3.bf16.msra.mxu1 %v345_v8 }
  0x43   :  { %323 = vmatprep.subr.bf16.mxu1 %v464_v0 }
  0x46   :  { %324 = vmatpush3.bf16.msra.mxu1 %v346_v9 }
  0x47   :  { %325 = vmatprep.subr.bf16.mxu1 %v464_v0 }
  0x4a   :  { %326 = vmatpush3.bf16.msra.mxu1 %v347_v10 }
  0xfd   :  { %v142_v13 = vpop.f32.mrf.mxu0 }
  0xfe   :  { %v143_v14 = vadd.f32 %v285_v11, %v142_v13 }
  0xff   :  { %v313_v15 = vpop.f32.mrf.mxu0 }
 0x100   :  { %348 = vtanh.f32 %v143_v14 }
 0x101   :  { %v145_v17 = vpop.f32.mrf.mxu0 }
 0x103   :  { %v314_v19 = vpop.f32.mrf.mxu0 }
 0x10d   :  { %v349_v26 = vpop.eup %348 }
 0x10e   :  { %v156_v27 = vmul.f32 %v349_v26, %v154_v24 }
 0x110   :  { %v166_v28 = vadd.f32 %v165_v25, %v156_v27 }
 0x112   :  { %v167_v29 = vpack.c.bf16 %v166_v28, %v166_v28 }
 0x114   :  { %328 = vmatmul.mubr.msk.bf16.vlgmr.msra.gmra.mxu1 %vm223_vm2, %v167_v29 }
 0x1d4   :  { %v261_v31 = vpop.f32.mrf.mxu1 }
 0x1d5   :  { %v262_v32 = vadd.f32 %v289_v30, %v261_v31 }
 0x1d6   :  { %v329_v33 = vpop.f32.mrf.mxu1 }
 0x1d7   :  { %267 = vst [vmem:[#allocation10] sm:$0xf] %v262_v32 }
 0x1d8   :  { %v264_v34 = vpop.f32.mrf.mxu1 }
 0x1d9   :  { %441 = shalt.err (!%p438_p10)
}
 0x1da   :  { %277 = dma.vmem_to_hbm [thread:$0]  %s275_s25, 64, %s538_s7, [#allocation4]   ;;  %v330_v35 = vpop.f32.mrf.mxu1 }
 0x1db   :  { %456 = dma.done.wait [#allocation4], 64  }
 0x1dc   :  { %457 = vsyncadd [#allocation4], 4294967232 }
 0x1dd   :  { %281 = vsyncpa [#allocation3], 1 }
 0x1de   :  { %282 = vsyncpa [#allocation6], 1 }
 0x1df   :  { %283 = vsyncpa [#allocation9], 1 }
 0x1e0   :  { %284 = vsyncpa [#allocation4], 1 }

</bundles_post_ra>
